<compile_context>
chip_gen: v5e
topology: v5e:2x2
jax: 0.10.0
libtpu: 0.0.40
codegen_flags: <defaults>
</compile_context>

<pallas_src>
import functools

import jax
import jax.numpy as jnp
from jax.experimental import pallas as pl
from jax.experimental.pallas import tpu as pltpu


def _sp_predictor_kernel(idx_ref, tbl_ref, pvec_ref, out_ref):
    # idx_ref : (2, TE) int32   — src/dst node ids for this edge tile
    # tbl_ref : (H, 2N) f32     — [relu(hs) @ W1a | relu(hs) @ W1b]^T, resident
    # pvec_ref: (H, 3)  f32     — col0 = b1, col1 = w2, col2 = b2 (broadcast)
    # out_ref : (1, TE) f32     — lane-dense logits
    n2 = tbl_ref.shape[1]                      # 2N
    n = n2 // 2
    te = idx_ref.shape[1]

    # Fused gather: one (2N, TE) one-hot — top half selects src rows of the
    # packed table, bottom half selects dst rows. Garbage indices in a partial
    # last tile just produce harmless columns that are sliced off outside.
    src_row = idx_ref[0:1, :]                  # (1, TE)
    dst_row = idx_ref[1:2, :] + n              # (1, TE), shifted into [N, 2N)
    row_iota = jax.lax.broadcasted_iota(jnp.int32, (n2, te), 0)
    onehot = ((row_iota == src_row) | (row_iota == dst_row)).astype(jnp.float32)
    # TODO(synk): for large node counts (N >~ 256) replace the one-hot matmul
    # with a jnp.take / DMA gather path — the one-hot is O(N*TE) VALU + VMEM.

    # Single MXU matmul: (H, 2N) x (2N, TE) = src-half + dst-half of Linear1.
    h_t = jnp.dot(tbl_ref[...], onehot, preferred_element_type=jnp.float32)  # (H, TE)
    h_t = jnp.maximum(h_t + pvec_ref[:, 0:1], 0.0)                           # + b1, ReLU

    # Linear2 (H -> 1) on VPU (broadcast mul) + XLU (sublane reduce): (1, TE).
    y = jnp.sum(h_t * pvec_ref[:, 1:2], axis=0, keepdims=True) + pvec_ref[0:1, 2:3]
    out_ref[...] = y.astype(out_ref.dtype)


def _pick_edge_tile(E, N, H, tile_e):
    """Edge-tile size from a per-generation VMEM budget (multiple of 128)."""
    try:
        info = pltpu.get_tpu_info()
        phys = int(getattr(info, "vmem_capacity_bytes", 0)) or (128 << 20)
    except Exception:  # pragma: no cover - conservative fallback off-TPU
        phys = 128 << 20
    # Leave headroom below physical: ~96 MiB on 128 MiB parts (v5e/v6e),
    # ~48 MiB on v7x's 64 MiB.
    vmem_limit = min(3 * phys // 4, 96 << 20)

    # Per-lane (per-edge) f32 VMEM footprint of one grid step:
    #   one-hot (2N, te) + iota/compare temps ~ 2 * 2N*4
    #   h_t (H, te) + temps                   ~ 2 * H*4
    #   idx (2, te) int32, double-buffered    =   16
    #   out (1, te) f32,  double-buffered     =    8
    per_lane = 16 * N + 8 * H + 24
    const_bytes = 2 * (H * 2 * N + H * 3) * 4          # double-buffered resident tables
    budget = (3 * vmem_limit) // 4 - const_bytes
    te_cap = max(128, (budget // per_lane) // 128 * 128)

    te = min(int(tile_e), te_cap, pl.cdiv(E, 128) * 128)
    te = max(128, (te // 128) * 128)
    return te, int(vmem_limit)


def shortest_path_predictor(hidden_states, edge_index, params, *, concat=True,
                            tile_e=16384):
    """hidden_states: (N, H) f32; edge_index: (2, E) int -> logits (E, 1) f32."""
    if not concat:
        # TODO(synk): concat=False (src+dst) mode is not fused here — the leading
        # ReLU does not commute with the node-sum, so it needs a separate kernel.
        raise NotImplementedError("only concat=True is implemented as a Pallas kernel")

    w1, b1, w2, b2 = params
    N, H = hidden_states.shape
    E = edge_index.shape[1]

    # --- grid-invariant node-table math, hoisted out of the per-tile body ---
    # ReLU commutes with the gather/concat, and Linear1 splits over the halves:
    #   relu(concat(src, dst)) @ W1 = relu(src) @ W1[:H] + relu(dst) @ W1[H:]
    hs_relu = jnp.maximum(hidden_states.astype(jnp.float32), 0.0)     # (N, H)
    a = hs_relu @ w1[:H, :]                                           # (N, H) src half
    b = hs_relu @ w1[H:, :]                                           # (N, H) dst half
    tbl = jnp.concatenate([a, b], axis=0).T                           # (H, 2N)

    # Pack the tiny per-hidden params into one VMEM block: [b1 | w2 | b2].
    pvec = jnp.concatenate(
        [b1.reshape(H, 1).astype(jnp.float32),
         w2.reshape(H, 1).astype(jnp.float32),
         jnp.broadcast_to(b2.reshape(1, 1).astype(jnp.float32), (H, 1))],
        axis=1)                                                       # (H, 3)

    idx = edge_index.astype(jnp.int32)

    te, vmem_limit = _pick_edge_tile(E, N, H, tile_e)
    num_tiles = pl.cdiv(E, te)

    flops = 2 * H * (2 * N) * E + 2 * H * E
    bytes_accessed = 12 * E + (H * 2 * N + H * 3) * 4

    out_flat = pl.pallas_call(
        _sp_predictor_kernel,
        out_shape=jax.ShapeDtypeStruct((1, num_tiles * te), jnp.float32),
        grid=(num_tiles,),
        in_specs=[
            pl.BlockSpec((2, te), lambda i: (0, i)),        # edge-index tile (partial last tile ok)
            pl.BlockSpec((H, 2 * N), lambda i: (0, 0)),     # packed node/Linear1 table (resident)
            pl.BlockSpec((H, 3), lambda i: (0, 0)),         # packed [b1 | w2 | b2]
        ],
        out_specs=pl.BlockSpec((1, te), lambda i: (0, i)),
        compiler_params=pltpu.CompilerParams(
            dimension_semantics=("parallel",),
            vmem_limit_bytes=vmem_limit,
        ),
        cost_estimate=pl.CostEstimate(
            flops=int(flops),
            transcendentals=0,
            bytes_accessed=int(bytes_accessed),
        ),
    )(idx, tbl, pvec)

    # Drop the padded lanes of the (possibly partial) last tile.
    return out_flat[0, :E].reshape(E, 1)


def init_params(key, hidden_dim, concat=True):
    in_dim = hidden_dim * 2 if concat else hidden_dim
    k1, k2, k3, k4 = jax.random.split(key, 4)
    bound1 = 1.0 / jnp.sqrt(in_dim)
    bound2 = 1.0 / jnp.sqrt(hidden_dim)
    w1 = jax.random.uniform(k1, (in_dim, hidden_dim), jnp.float32, -bound1, bound1)
    b1 = jax.random.uniform(k2, (1, hidden_dim), jnp.float32, -bound1, bound1)
    w2 = jax.random.uniform(k3, (hidden_dim, 1), jnp.float32, -bound2, bound2)
    b2 = jax.random.uniform(k4, (1, 1), jnp.float32, -bound2, bound2)
    return (w1, b1, w2, b2)


def reference_forward(hidden_states, edge_index, params, concat=True):
    w1, b1, w2, b2 = params
    src = hidden_states[edge_index[0]]
    dst = hidden_states[edge_index[1]]
    x = jnp.concatenate([src, dst], axis=-1) if concat else src + dst
    x = jnp.maximum(x, 0.0)
    h = jnp.maximum(x @ w1 + b1, 0.0)
    return h @ w2 + b2


if __name__ == "__main__":
    key = jax.random.PRNGKey(0)
    k_h, k_e, k_p = jax.random.split(key, 3)

    hidden_dim = 32
    num_nodes = 16
    num_edges = 1000  # not a multiple of 128: exercises the partial last tile

    hidden_states = jax.random.normal(k_h, (num_nodes, hidden_dim), jnp.float32)
    edge_index = jax.random.randint(k_e, (2, num_edges), 0, num_nodes, jnp.int32)
    params = init_params(k_p, hidden_dim, concat=True)

    fwd = jax.jit(functools.partial(shortest_path_predictor, concat=True))
    logits = fwd(hidden_states, edge_index, params)
    jax.block_until_ready(logits)

    ref = reference_forward(hidden_states, edge_index, params, concat=True)
    assert logits.shape == (num_edges, 1)
    assert jnp.allclose(logits, ref, atol=1e-4, rtol=1e-4)

    print("KERNEL_OK")
</pallas_src>

<mosaic_0001>
module attributes {stable_mosaic.version = 11 : i64} {
  func.func @_sp_predictor_kernel(%arg0: i32, %arg1: memref<2x1024xi32, #tpu.memory_space<vmem>>, %arg2: memref<32x32xf32, #tpu.memory_space<vmem>>, %arg3: memref<32x3xf32, #tpu.memory_space<vmem>>, %arg4: memref<1x1024xf32, #tpu.memory_space<vmem>>) attributes {dimension_semantics = [#tpu.dimension_semantics<parallel>], iteration_bounds = array<i64: 1>, scalar_prefetch = 0 : i64, scratch_operands = 0 : i64, tpu.core_type = #tpu.core_type<tc>, window_params = [{transform_indices = @transform_0, window_bounds = array<i64: 2, 1024>}, {pipeline_mode = #tpu.pipeline_mode<synchronous>, transform_indices = @transform_1, window_bounds = array<i64: 32, 32>}, {pipeline_mode = #tpu.pipeline_mode<synchronous>, transform_indices = @transform_2, window_bounds = array<i64: 32, 3>}, {transform_indices = @transform_3, window_bounds = array<i64: 1, 1024>}]} {
    %c0 = arith.constant 0 : index
    %c0_0 = arith.constant 0 : index
    %0 = vector.load %arg1[%c0, %c0_0] : memref<2x1024xi32, #tpu.memory_space<vmem>>, vector<1x1024xi32>
    %c1 = arith.constant 1 : index
    %c0_1 = arith.constant 0 : index
    %1 = vector.load %arg1[%c1, %c0_1] : memref<2x1024xi32, #tpu.memory_space<vmem>>, vector<1x1024xi32>
    %c16_i32 = arith.constant 16 : i32
    %2 = vector.broadcast %c16_i32 : i32 to vector<1x1024xi32>
    %3 = arith.addi %1, %2 : vector<1x1024xi32>
    %4 = tpu.iota {dimensions = array<i32: 0>} : vector<32x1024xi32>
    %5 = vector.broadcast %0 : vector<1x1024xi32> to vector<32x1024xi32>
    %6 = arith.cmpi eq, %4, %5 : vector<32x1024xi32>
    %7 = vector.broadcast %3 : vector<1x1024xi32> to vector<32x1024xi32>
    %8 = arith.cmpi eq, %4, %7 : vector<32x1024xi32>
    %9 = arith.ori %6, %8 : vector<32x1024xi1>
    %10 = arith.extui %9 : vector<32x1024xi1> to vector<32x1024xi32>
    %11 = arith.sitofp %10 : vector<32x1024xi32> to vector<32x1024xf32>
    %c0_2 = arith.constant 0 : index
    %c0_3 = arith.constant 0 : index
    %12 = vector.load %arg2[%c0_2, %c0_3] : memref<32x32xf32, #tpu.memory_space<vmem>>, vector<32x32xf32>
    %cst = arith.constant dense<0.000000e+00> : vector<32x1024xf32>
    %13 = tpu.matmul %12, %11, %cst {dimension_numbers = #tpu.dot_dimension_numbers<[1], [0], [0], [1], [0, 0, 1, 1], [], []>} : vector<32x32xf32>, vector<32x1024xf32>, vector<32x1024xf32> -> vector<32x1024xf32>
    %c0_4 = arith.constant 0 : index
    %c0_5 = arith.constant 0 : index
    %14 = vector.load %arg3[%c0_4, %c0_5] : memref<32x3xf32, #tpu.memory_space<vmem>>, vector<32x1xf32>
    %15 = vector.broadcast %14 : vector<32x1xf32> to vector<32x1024xf32>
    %16 = arith.addf %13, %15 : vector<32x1024xf32>
    %cst_6 = arith.constant 0.000000e+00 : f32
    %17 = vector.broadcast %cst_6 : f32 to vector<32x1024xf32>
    %18 = arith.maximumf %16, %17 : vector<32x1024xf32>
    %c0_7 = arith.constant 0 : index
    %c1_8 = arith.constant 1 : index
    %19 = vector.load %arg3[%c0_7, %c1_8] : memref<32x3xf32, #tpu.memory_space<vmem>>, vector<32x1xf32>
    %20 = vector.broadcast %19 : vector<32x1xf32> to vector<32x1024xf32>
    %21 = arith.mulf %18, %20 : vector<32x1024xf32>
    %cst_9 = arith.constant dense<0.000000e+00> : vector<1024xf32>
    %22 = vector.multi_reduction <add>, %21, %cst_9 [0] : vector<32x1024xf32> to vector<1024xf32>
    %23 = vector.shape_cast %22 : vector<1024xf32> to vector<1x1024xf32>
    %c0_10 = arith.constant 0 : index
    %c2 = arith.constant 2 : index
    %24 = vector.load %arg3[%c0_10, %c2] : memref<32x3xf32, #tpu.memory_space<vmem>>, vector<1x1xf32>
    %25 = vector.broadcast %24 : vector<1x1xf32> to vector<1x1024xf32>
    %26 = arith.addf %23, %25 : vector<1x1024xf32>
    %c0_11 = arith.constant 0 : index
    %c0_12 = arith.constant 0 : index
    %27 = vector.load %arg4[%c0_11, %c0_12] : memref<1x1024xf32, #tpu.memory_space<vmem>>, vector<1x1024xf32>
    tpu.vector_store %arg4[%c0_11, %c0_12], %26 {strides = array<i32>} : memref<1x1024xf32, #tpu.memory_space<vmem>>, vector<1x1024xf32>,
    return
  }
  func.func @transform_0(%arg0: i32) -> (i32, i32) {
    %c0_i32 = arith.constant 0 : i32
    %c0_i32_0 = arith.constant 0 : i32
    return %c0_i32, %arg0 : i32, i32
  }
  func.func @transform_1(%arg0: i32) -> (i32, i32) {
    %c0_i32 = arith.constant 0 : i32
    %c0_i32_0 = arith.constant 0 : i32
    %c0_i32_1 = arith.constant 0 : i32
    return %c0_i32, %c0_i32_0 : i32, i32
  }
  func.func @transform_2(%arg0: i32) -> (i32, i32) {
    %c0_i32 = arith.constant 0 : i32
    %c0_i32_0 = arith.constant 0 : i32
    %c0_i32_1 = arith.constant 0 : i32
    return %c0_i32, %c0_i32_0 : i32, i32
  }
  func.func @transform_3(%arg0: i32) -> (i32, i32) {
    %c0_i32 = arith.constant 0 : i32
    %c0_i32_0 = arith.constant 0 : i32
    return %c0_i32, %arg0 : i32, i32
  }
}

</mosaic_0001>

<bundles_post_ra>
// kernel: shortest_path_predictor.1
= control target key start
LH: loop header
LB: loop body
LE: loop exit
PB: predicated region body
PF: predicated region fallthrough
CT: control target
= control target key end

     0   :  { %v18_v0 = vlaneseq  ;;  %v781_v3 = vmov 0   ;;  %v782_v17 = vmov 1.0   ;;  %v783_v32 = vmov 1   ;;  %s1286_s0 = inlined_call_operand.vmem [shape: s32[2,1000], index: 0, kind: input, shape index: {}]   ;;  %s1287_s2 = inlined_call_operand.vmem [shape: f32[32,3], index: 2, kind: input, shape index: {}]   ;;  %s1288_s1 = inlined_call_operand.vmem [shape: f32[32,32], index: 1, kind: input, shape index: {}]   ;;  %s1289_s3 = inlined_call_operand.vmem [shape: f32[1,1024], index: 3, kind: output, shape index: {}]  }
   0x1   :  { %v808_v1 = vld [vmem:[%s1286_s0] ss:$2 sm:$0xff]  ;;  %v673_v2 = vld [vmem:[%s1286_s0 + $0x1] ss:$2 sm:$0xff]  ;;  %774 = vset.pattern.permute.xlu0 %v781_v3  ;;  %775 = vset.pattern.permute.xlu1 %v781_v3  ;;  %v905_v20 = vld [vmem:[%s1287_s2 + $0x10] sm:$0xff]  ;;  %v784_v36 = vmov 2  }
   0x2   :  { %v813_v4 = vadd.s32 16, %v673_v2  ;;  %v815_v5 = vshrl.u32 %v18_v0, 7  ;;  %v818_v6 = vperm.slane %v808_v1, 0  ;;  %v821_v7 = vperm.slane %v808_v1, 1  ;;  %v826_v8 = vld [vmem:[%s1287_s2] sm:$0xff]  ;;  %v895_v19 = vld [vmem:[%s1287_s2 + $0x8] sm:$0xff]  ;;  %219 = vperm.xlu1 %775, %v905_v20   ;;  %776 = vset.pattern.permute.xlu2 %v783_v32 }
   0x3   :  { %v829_v9 = vperm.slane %v808_v1, 2  ;;  %v832_v10 = vperm.slane %v808_v1, 3  ;;  %209 = vperm.xlu0 %774, %v826_v8   ;;  %v933_v21 = vperm.slane %v808_v1, 6  ;;  %v950_v23 = vperm.slane %v808_v1, 7  ;;  %v969_v25 = vld [vmem:[%s1288_s1] sm:$0xff]  ;;  %v1028_v30 = vld [vmem:[%s1287_s2 + $0x18] sm:$0xff]  ;;  %505 = vperm.xlu2 %776, %v826_v8  }
   0x4   :  { %v836_v11 = vadd.s32 24, %v815_v5  ;;  %v839_v12 = vperm.slane %v813_v4, 0  ;;  %v842_v13 = vperm.slane %v813_v4, 1  ;;  %v845_v14 = vperm.slane %v813_v4, 2  ;;  %v1060_v31 = vld [vmem:[%s1288_s1 + $0x8] sm:$0xff]  ;;  %v201_v33 = vld [vmem:[%s1288_s1 + $0x10] sm:$0xff] }
   0x5   :  { %v848_v15 = vperm.slane %v813_v4, 3  ;;  %v851_v16 = vadd.s32 16, %v815_v5  ;;  %v875_v18 = vadd.s32 8, %v815_v5  ;;  %v936_v22 = vperm.slane %v813_v4, 6  ;;  %v202_v34 = vld [vmem:[%s1288_s1 + $0x18] sm:$0xff] }
   0x6   :  { %vm55_vm0 = vcmp.eq.s32.totalorder %v836_v11, %v818_v6  ;;  %vm95_vm1 = vcmp.eq.s32.totalorder %v836_v11, %v839_v12  ;;  %vm56_vm2 = vcmp.eq.s32.totalorder %v836_v11, %v821_v7  ;;  %vm96_vm3 = vcmp.eq.s32.totalorder %v836_v11, %v842_v13  ;;  %v624_v35 = vld [vmem:[%s1287_s2] sm:$0x1] }
   0x7   :  { %vm127_vm4 = vmor %vm55_vm0, %vm95_vm1  ;;  %vm57_vm5 = vcmp.eq.s32.totalorder %v836_v11, %v829_v9  ;;  %vm97_vm6 = vcmp.eq.s32.totalorder %v836_v11, %v845_v14  ;;  %vm58_vm7 = vcmp.eq.s32.totalorder %v836_v11, %v832_v10  ;;  %vm98_vm8 = vcmp.eq.s32.totalorder %v836_v11, %v848_v15 }
   0x8   :  { %706 = vmatpush.msk.msra.mxu0 %vm127_vm4, %v782_v17  ;;  %vm128_vm9 = vmor %vm56_vm2, %vm96_vm3  ;;  %vm47_vm10 = vcmp.eq.s32.totalorder %v851_v16, %v818_v6  ;;  %vm87_vm11 = vcmp.eq.s32.totalorder %v851_v16, %v839_v12  ;;  %vm48_vm13 = vcmp.eq.s32.totalorder %v851_v16, %v821_v7  ;;  %vm88_vm14 = vcmp.eq.s32.totalorder %v851_v16, %v842_v13 }
   0x9   :  { %714 = vmatpush.msk.msra.mxu1 %vm128_vm9, %v782_v17  ;;  %vm129_vm12 = vmor %vm57_vm5, %vm97_vm6  ;;  %vm49_vm0 = vcmp.eq.s32.totalorder %v851_v16, %v829_v9  ;;  %vm89_vm1 = vcmp.eq.s32.totalorder %v851_v16, %v845_v14  ;;  %vm50_vm3 = vcmp.eq.s32.totalorder %v851_v16, %v832_v10  ;;  %vm90_vm4 = vcmp.eq.s32.totalorder %v851_v16, %v848_v15 }
   0xa   :  { %722 = vmatpush.msk.msra.mxu2 %vm129_vm12, %v782_v17  ;;  %vm130_vm15 = vmor %vm58_vm7, %vm98_vm8  ;;  %vm39_vm6 = vcmp.eq.s32.totalorder %v875_v18, %v818_v6  ;;  %vm79_vm7 = vcmp.eq.s32.totalorder %v875_v18, %v839_v12  ;;  %vm40_vm9 = vcmp.eq.s32.totalorder %v875_v18, %v821_v7  ;;  %vm41_vm12 = vcmp.eq.s32.totalorder %v875_v18, %v829_v9 }
   0xb   :  { %730 = vmatpush.msk.msra.mxu3 %vm130_vm15, %v782_v17  ;;  %vm119_vm2 = vmor %vm47_vm10, %vm87_vm11  ;;  %vm80_vm10 = vcmp.eq.s32.totalorder %v875_v18, %v842_v13  ;;  %214 = vperm.xlu0 %774, %v895_v19   ;;  %vm42_vm15 = vcmp.eq.s32.totalorder %v875_v18, %v832_v10  ;;  %v953_v24 = vperm.slane %v813_v4, 7  ;;  %v972_v26 = vperm.slane %v808_v1, 4 }
   0xc   :  { %707 = vmatpush.msk.msra.mxu0 %vm119_vm2, %v782_v17  ;;  %vm120_vm5 = vmor %vm48_vm13, %vm88_vm14  ;;  %vm81_vm13 = vcmp.eq.s32.totalorder %v875_v18, %v845_v14  ;;  %v975_v27 = vperm.slane %v813_v4, 4  ;;  %v989_v28 = vperm.slane %v808_v1, 5  ;;  %v992_v29 = vperm.slane %v813_v4, 5  ;;  %224 = vperm.xlu1 %775, %v1028_v30  }
   0xd   :  { %715 = vmatpush.msk.msra.mxu1 %vm120_vm5, %v782_v17  ;;  %vm121_vm8 = vmor %vm49_vm0, %vm89_vm1  ;;  %vm82_vm0 = vcmp.eq.s32.totalorder %v875_v18, %v848_v15  ;;  %vm227_vm1 = vcmask 261120   ;;  %509 = vperm.xlu2 %776, %v895_v19  }
   0xe   :  { %723 = vmatpush.msk.msra.mxu2 %vm121_vm8, %v782_v17  ;;  %vm122_vm11 = vmor %vm50_vm3, %vm90_vm4  ;;  %vm31_vm3 = vcmp.eq.s32.totalorder %v815_v5, %v818_v6  ;;  %vm71_vm4 = vcmp.eq.s32.totalorder %v815_v5, %v839_v12 }
   0xf   :  { %731 = vmatpush.msk.msra.mxu3 %vm122_vm11, %v782_v17  ;;  %vm111_vm14 = vmor %vm39_vm6, %vm79_vm7  ;;  %vm32_vm6 = vcmp.eq.s32.totalorder %v815_v5, %v821_v7  ;;  %vm72_vm7 = vcmp.eq.s32.totalorder %v815_v5, %v842_v13 }
  0x10   :  { %708 = vmatpush.msk.msra.mxu0 %vm111_vm14, %v782_v17  ;;  %vm112_vm2 = vmor %vm40_vm9, %vm80_vm10  ;;  %vm33_vm9 = vcmp.eq.s32.totalorder %v815_v5, %v829_v9  ;;  %vm73_vm10 = vcmp.eq.s32.totalorder %v815_v5, %v845_v14 }
  0x11   :  { %716 = vmatpush.msk.msra.mxu1 %vm112_vm2, %v782_v17  ;;  %vm113_vm5 = vmor %vm41_vm12, %vm81_vm13  ;;  %vm34_vm12 = vcmp.eq.s32.totalorder %v815_v5, %v832_v10  ;;  %vm74_vm13 = vcmp.eq.s32.totalorder %v815_v5, %v848_v15 }
  0x12   :  { %724 = vmatpush.msk.msra.mxu2 %vm113_vm5, %v782_v17  ;;  %vm114_vm8 = vmor %vm42_vm15, %vm82_vm0  ;;  %vm61_vm15 = vcmp.eq.s32.totalorder %v836_v11, %v933_v21  ;;  %vm101_vm0 = vcmp.eq.s32.totalorder %v836_v11, %v936_v22 }
  0x13   :  { %732 = vmatpush.msk.msra.mxu3 %vm114_vm8, %v782_v17  ;;  %vm103_vm11 = vmor %vm31_vm3, %vm71_vm4  ;;  %vm62_vm3 = vcmp.eq.s32.totalorder %v836_v11, %v950_v23  ;;  %vm102_vm4 = vcmp.eq.s32.totalorder %v836_v11, %v953_v24  ;;  %777 = vset.pattern.permute.xlu0 %v783_v32 }
  0x14   :  { %709 = vmatpush.msk.msra.mxu0 %vm103_vm11, %v782_v17  ;;  %vm104_vm14 = vmor %vm32_vm6, %vm72_vm7  ;;  %vm59_vm6 = vcmp.eq.s32.totalorder %v836_v11, %v972_v26  ;;  %vm99_vm7 = vcmp.eq.s32.totalorder %v836_v11, %v975_v27  ;;  %513 = vperm.xlu0 %777, %v905_v20  }
  0x15   :  { %717 = vmatpush.msk.msra.mxu1 %vm104_vm14, %v782_v17  ;;  %vm105_vm2 = vmor %vm33_vm9, %vm73_vm10  ;;  %710 = vmatmul.msk.f32.vlgmr.msra.gmra.mxu0 %vm227_vm1, %v969_v25  ;;  %vm60_vm9 = vcmp.eq.s32.totalorder %v836_v11, %v989_v28  ;;  %vm100_vm10 = vcmp.eq.s32.totalorder %v836_v11, %v992_v29 }
  0x16   :  { %725 = vmatpush.msk.msra.mxu2 %vm105_vm2, %v782_v17  ;;  %vm106_vm5 = vmor %vm34_vm12, %vm74_vm13  ;;  %718 = vmatmul.msk.f32.vlgmr.msra.gmra.mxu1 %vm227_vm1, %v969_v25  ;;  %vm53_vm12 = vcmp.eq.s32.totalorder %v851_v16, %v933_v21  ;;  %vm93_vm13 = vcmp.eq.s32.totalorder %v851_v16, %v936_v22 }
  0x17   :  { %733 = vmatpush.msk.msra.mxu3 %vm106_vm5, %v782_v17  ;;  %726 = vmatmul.msk.f32.vlgmr.msra.gmra.mxu2 %vm227_vm1, %v969_v25  ;;  %vm133_vm8 = vmor %vm61_vm15, %vm101_vm0  ;;  %vm54_vm15 = vcmp.eq.s32.totalorder %v851_v16, %v950_v23  ;;  %vm94_vm0 = vcmp.eq.s32.totalorder %v851_v16, %v953_v24 }
  0x18   :  { %734 = vmatmul.msk.f32.vlgmr.msra.gmra.mxu3 %vm227_vm1, %v969_v25  ;;  %754 = vmatpush.msk.msrb.mxu2 %vm133_vm8, %v782_v17  ;;  %vm134_vm11 = vmor %vm62_vm3, %vm102_vm4  ;;  %vm51_vm3 = vcmp.eq.s32.totalorder %v851_v16, %v972_v26  ;;  %vm91_vm4 = vcmp.eq.s32.totalorder %v851_v16, %v975_v27 }
  0x19   :  { %762 = vmatpush.msk.msrb.mxu3 %vm134_vm11, %v782_v17  ;;  %vm131_vm14 = vmor %vm59_vm6, %vm99_vm7  ;;  %vm52_vm6 = vcmp.eq.s32.totalorder %v851_v16, %v989_v28  ;;  %vm92_vm7 = vcmp.eq.s32.totalorder %v851_v16, %v992_v29  ;;  %778 = vset.pattern.permute.xlu1 %v783_v32 }
  0x1a   :  { %738 = vmatpush.msk.msrb.mxu0 %vm131_vm14, %v782_v17  ;;  %vm132_vm2 = vmor %vm60_vm9, %vm100_vm10  ;;  %vm45_vm9 = vcmp.eq.s32.totalorder %v875_v18, %v933_v21  ;;  %vm85_vm10 = vcmp.eq.s32.totalorder %v875_v18, %v936_v22  ;;  %517 = vperm.xlu1 %778, %v1028_v30  }
  0x1b   :  { %746 = vmatpush.msk.msrb.mxu1 %vm132_vm2, %v782_v17  ;;  %vm125_vm5 = vmor %vm53_vm12, %vm93_vm13  ;;  %vm46_vm12 = vcmp.eq.s32.totalorder %v875_v18, %v950_v23  ;;  %vm86_vm13 = vcmp.eq.s32.totalorder %v875_v18, %v953_v24  ;;  %779 = vset.pattern.permute.xlu2 %v784_v36 }
  0x1c   :  { %755 = vmatpush.msk.msrb.mxu2 %vm125_vm5, %v782_v17  ;;  %vm126_vm8 = vmor %vm54_vm15, %vm94_vm0  ;;  %vm43_vm15 = vcmp.eq.s32.totalorder %v875_v18, %v972_v26  ;;  %vm83_vm0 = vcmp.eq.s32.totalorder %v875_v18, %v975_v27  ;;  %780 = vset.pattern.permute.xlu0 %v784_v36 }
  0x1d   :  { %711 = vmatmul.msk.f32.gmra.mxu0 %vm227_vm1, %v1060_v31  ;;  %763 = vmatpush.msk.msrb.mxu3 %vm126_vm8, %v782_v17  ;;  %vm123_vm11 = vmor %vm51_vm3, %vm91_vm4  ;;  %vm44_vm3 = vcmp.eq.s32.totalorder %v875_v18, %v989_v28  ;;  %vm84_vm4 = vcmp.eq.s32.totalorder %v875_v18, %v992_v29 }
  0x1e   :  { %719 = vmatmul.msk.f32.gmra.mxu1 %vm227_vm1, %v1060_v31  ;;  %739 = vmatpush.msk.msrb.mxu0 %vm123_vm11, %v782_v17  ;;  %vm124_vm14 = vmor %vm52_vm6, %vm92_vm7  ;;  %vm37_vm6 = vcmp.eq.s32.totalorder %v815_v5, %v933_v21  ;;  %vm77_vm7 = vcmp.eq.s32.totalorder %v815_v5, %v936_v22 }
  0x1f   :  { %727 = vmatmul.msk.f32.gmra.mxu2 %vm227_vm1, %v1060_v31  ;;  %747 = vmatpush.msk.msrb.mxu1 %vm124_vm14, %v782_v17  ;;  %vm117_vm2 = vmor %vm45_vm9, %vm85_vm10  ;;  %vm38_vm9 = vcmp.eq.s32.totalorder %v815_v5, %v950_v23  ;;  %vm78_vm10 = vcmp.eq.s32.totalorder %v815_v5, %v953_v24 }
  0x20   :  { %735 = vmatmul.msk.f32.gmra.mxu3 %vm227_vm1, %v1060_v31  ;;  %756 = vmatpush.msk.msrb.mxu2 %vm117_vm2, %v782_v17  ;;  %vm118_vm5 = vmor %vm46_vm12, %vm86_vm13  ;;  %vm35_vm12 = vcmp.eq.s32.totalorder %v815_v5, %v972_v26  ;;  %vm75_vm13 = vcmp.eq.s32.totalorder %v815_v5, %v975_v27 }
  0x21   :  { %764 = vmatpush.msk.msrb.mxu3 %vm118_vm5, %v782_v17  ;;  %vm115_vm8 = vmor %vm43_vm15, %vm83_vm0  ;;  %vm36_vm15 = vcmp.eq.s32.totalorder %v815_v5, %v989_v28  ;;  %vm76_vm0 = vcmp.eq.s32.totalorder %v815_v5, %v992_v29  ;;  %627 = vperm.xlu2 %779, %v624_v35   ;;  %vm655_vm5 = vcmask 1042434  }
  0x22   :  { %740 = vmatpush.msk.msrb.mxu0 %vm115_vm8, %v782_v17  ;;  %vm116_vm11 = vmor %vm44_vm3, %vm84_vm4  ;;  %vm661_vm8 = vcmask 1046534  }
  0x23   :  { %748 = vmatpush.msk.msrb.mxu1 %vm116_vm11, %v782_v17  ;;  %vm109_vm14 = vmor %vm37_vm6, %vm77_vm7  ;;  %vm657_vm6 = vcmask 1041408   ;;  %vm659_vm7 = vcmask 1044484  }
  0x24   :  { %757 = vmatpush.msk.msrb.mxu2 %vm109_vm14, %v782_v17  ;;  %vm110_vm2 = vmor %vm38_vm9, %vm78_vm10  ;;  %vm663_vm9 = vcmask 1045508   ;;  %vm665_vm10 = vcmask 1043456  }
  0x25   :  { %712 = vmatmul.msk.f32.gmra.mxu0 %vm227_vm1, %v201_v33  ;;  %765 = vmatpush.msk.msrb.mxu3 %vm110_vm2, %v782_v17  ;;  %vm107_vm3 = vmor %vm35_vm12, %vm75_vm13 }
  0x26   :  { %720 = vmatmul.msk.f32.gmra.mxu1 %vm227_vm1, %v201_v33  ;;  %741 = vmatpush.msk.msrb.mxu0 %vm107_vm3, %v782_v17  ;;  %vm108_vm4 = vmor %vm36_vm15, %vm76_vm0 }
  0x27   :  { %728 = vmatmul.msk.f32.gmra.mxu2 %vm227_vm1, %v201_v33  ;;  %749 = vmatpush.msk.msrb.mxu1 %vm108_vm4, %v782_v17 }
  0x28   :  { %736 = vmatmul.msk.f32.gmra.mxu3 %vm227_vm1, %v201_v33 }
  0x2d   :  { %713 = vmatmul.msk.f32.gmra.mxu0 %vm227_vm1, %v202_v34 }
  0x2e   :  { %721 = vmatmul.msk.f32.gmra.mxu1 %vm227_vm1, %v202_v34 }
  0x2f   :  { %729 = vmatmul.msk.f32.gmra.mxu2 %vm227_vm1, %v202_v34 }
  0x30   :  { %737 = vmatmul.msk.f32.gmra.mxu3 %vm227_vm1, %v202_v34 }
  0x35   :  { %742 = vmatmul.msk.f32.vlgmr.msrb.gmra.mxu0 %vm227_vm1, %v969_v25 }
  0x36   :  { %750 = vmatmul.msk.f32.vlgmr.msrb.gmra.mxu1 %vm227_vm1, %v969_v25 }
  0x37   :  { %758 = vmatmul.msk.f32.vlgmr.msrb.gmra.mxu2 %vm227_vm1, %v969_v25 }
  0x38   :  { %766 = vmatmul.msk.f32.vlgmr.msrb.gmra.mxu3 %vm227_vm1, %v969_v25 }
  0x3d   :  { %743 = vmatmul.msk.f32.gmra.mxu0 %vm227_vm1, %v1060_v31 }
  0x3e   :  { %751 = vmatmul.msk.f32.gmra.mxu1 %vm227_vm1, %v1060_v31 }
  0x3f   :  { %759 = vmatmul.msk.f32.gmra.mxu2 %vm227_vm1, %v1060_v31 }
  0x40   :  { %767 = vmatmul.msk.f32.gmra.mxu3 %vm227_vm1, %v1060_v31 }
  0x45   :  { %744 = vmatmul.msk.f32.gmra.mxu0 %vm227_vm1, %v201_v33 }
  0x46   :  { %752 = vmatmul.msk.f32.gmra.mxu1 %vm227_vm1, %v201_v33 }
  0x47   :  { %760 = vmatmul.msk.f32.gmra.mxu2 %vm227_vm1, %v201_v33 }
  0x48   :  { %768 = vmatmul.msk.f32.gmra.mxu3 %vm227_vm1, %v201_v33 }
  0x4d   :  { %745 = vmatmul.msk.f32.gmra.mxu0 %vm227_vm1, %v202_v34 }
  0x4e   :  { %753 = vmatmul.msk.f32.gmra.mxu1 %vm227_vm1, %v202_v34 }
  0x4f   :  { %761 = vmatmul.msk.f32.gmra.mxu2 %vm227_vm1, %v202_v34 }
  0x50   :  { %769 = vmatmul.msk.f32.gmra.mxu3 %vm227_vm1, %v202_v34  ;;  %vm653_vm1 = vcmask 1040384  }
  0x5d   :  { %v1196_v49 = vpop.permute.xlu2 %505 }
  0x67   :  { %v1206_v1 = vpop.permute.xlu2 %509 }
  0x74   :  { %v1194_v48 = vpop.permute.xlu1 %219 }
  0x75   :  { %v1192_v43 = vpop.permute.xlu0 %209 }
  0x7d   :  { %v1198_v54 = vpop.permute.xlu0 %214 }
  0x7e   :  { %v1201_v56 = vpop.permute.xlu1 %224 }
  0x86   :  { %v1216_v13 = vpop.permute.xlu0 %513 }
  0x8c   :  { %v1222_v22 = vpop.permute.xlu1 %517 }
  0x92   :  { %v257_v37 = vpop.f32.mrf.mxu0 }
  0x93   :  { %v286_v38 = vpop.f32.mrf.mxu1  ;;  %v258_v4 = vadd.f32 %v257_v37, %v1192_v43 }
  0x94   :  { %v287_v57 = vadd.f32 %v286_v38, %v1192_v43 }
  0x95   :  { %v472_v19 = vmax.f32 %v258_v4, 0.0 }
  0x96   :  { %v473_v5 = vmax.f32 %v287_v57, 0.0 }
  0x98   :  { %v521_v20 = vmul.f32 %v1196_v49, %v473_v5 }
  0x9a   :  { %v315_v39 = vpop.f32.mrf.mxu2  ;;  %v260_v40 = vpop.f32.mrf.mxu0 }
  0x9b   :  { %v344_v41 = vpop.f32.mrf.mxu3  ;;  %v289_v42 = vpop.f32.mrf.mxu1  ;;  %v261_v61 = vadd.f32 %v260_v40, %v1198_v54  ;;  %v316_v7 = vadd.f32 %v315_v39, %v1192_v43  ;;  %v520_v40 = vmul.f32 %v1196_v49, %v472_v19 }
  0x9c   :  { %v290_v55 = vadd.f32 %v289_v42, %v1198_v54  ;;  %v345_v10 = vadd.f32 %v344_v41, %v1192_v43 }
  0x9d   :  { %v480_v11 = vmax.f32 %v261_v61, 0.0  ;;  %v474_v24 = vmax.f32 %v316_v7, 0.0 }
  0x9e   :  { %v481_v62 = vmax.f32 %v290_v55, 0.0  ;;  %v475_v30 = vmax.f32 %v345_v10, 0.0 }
  0x9f   :  { %v528_v31 = vmul.f32 %v1206_v1, %v480_v11 }
  0xa0   :  { %v529_v12 = vmul.f32 %v1206_v1, %v481_v62 }
  0xa2   :  { %v318_v44 = vpop.f32.mrf.mxu2  ;;  %v263_v45 = vpop.f32.mrf.mxu0  ;;  %v561_v32 = vadd.f32 %v529_v12, %v521_v20 }
  0xa3   :  { %v347_v46 = vpop.f32.mrf.mxu3  ;;  %v292_v47 = vpop.f32.mrf.mxu1  ;;  %v319_v2 = vadd.f32 %v318_v44, %v1198_v54  ;;  %v264_v6 = vadd.f32 %v263_v45, %v1194_v48  ;;  %v522_v44 = vmul.f32 %v1196_v49, %v474_v24 }
  0xa4   :  { %v293_v58 = vadd.f32 %v292_v47, %v1194_v48  ;;  %v348_v8 = vadd.f32 %v347_v46, %v1198_v54 }
  0xa5   :  { %v482_v15 = vmax.f32 %v319_v2, 0.0  ;;  %v488_v21 = vmax.f32 %v264_v6, 0.0 }
  0xa6   :  { %v489_v9 = vmax.f32 %v293_v58, 0.0  ;;  %v483_v25 = vmax.f32 %v348_v8, 0.0 }
  0xa7   :  { %v530_v36 = vmul.f32 %v1206_v1, %v482_v15  ;;  %v536_v41 = vmul.f32 %v1216_v13, %v488_v21 }
  0xa8   :  { %v537_v26 = vmul.f32 %v1216_v13, %v489_v9  ;;  %v531_v45 = vmul.f32 %v1206_v1, %v483_v25 }
  0xaa   :  { %v321_v50 = vpop.f32.mrf.mxu2  ;;  %v266_v51 = vpop.f32.mrf.mxu0  ;;  %v562_v46 = vadd.f32 %v561_v32, %v537_v26 }
  0xab   :  { %v350_v52 = vpop.f32.mrf.mxu3  ;;  %v295_v53 = vpop.f32.mrf.mxu1  ;;  %v322_v14 = vadd.f32 %v321_v50, %v1194_v48  ;;  %v267_v17 = vadd.f32 %v266_v51, %v1201_v56  ;;  %v523_v50 = vmul.f32 %v1196_v49, %v475_v30  ;;  %v552_v51 = vadd.f32 %v528_v31, %v520_v40 }
  0xac   :  { %v296_v3 = vadd.f32 %v295_v53, %v1201_v56  ;;  %v351_v16 = vadd.f32 %v350_v52, %v1194_v48  ;;  %v570_v53 = vadd.f32 %v530_v36, %v522_v44 }
  0xad   :  { %v490_v33 = vmax.f32 %v322_v14, 0.0  ;;  %v496_v38 = vmax.f32 %v267_v17, 0.0  ;;  %v579_v2 = vadd.f32 %v531_v45, %v523_v50 }
  0xae   :  { %v497_v18 = vmax.f32 %v296_v3, 0.0  ;;  %v491_v37 = vmax.f32 %v351_v16, 0.0 }
  0xaf   :  { %v538_v52 = vmul.f32 %v1216_v13, %v490_v33  ;;  %v544_v57 = vmul.f32 %v1222_v22, %v496_v38 }
  0xb0   :  { %v545_v39 = vmul.f32 %v1222_v22, %v497_v18  ;;  %v539_v55 = vmul.f32 %v1216_v13, %v491_v37 }
  0xb1   :  { %v571_v8 = vadd.f32 %v570_v53, %v538_v52 }
  0xb2   :  { %v324_v59 = vpop.f32.mrf.mxu2  ;;  %v373_v60 = vpop.f32.mrf.mxu0  ;;  %v563_v58 = vadd.f32 %v562_v46, %v545_v39  ;;  %v580_v12 = vadd.f32 %v579_v2, %v539_v55 }
  0xb3   :  { %v353_v63 = vpop.f32.mrf.mxu3  ;;  %v402_v0 = vpop.f32.mrf.mxu1  ;;  %v325_v23 = vadd.f32 %v324_v59, %v1201_v56  ;;  %v553_v59 = vadd.f32 %v552_v51, %v536_v41  ;;  %v374_v62 = vadd.f32 %v373_v60, %v1192_v43 }
  0xb4   :  { %v354_v27 = vadd.f32 %v353_v63, %v1201_v56  ;;  %v403_v4 = vadd.f32 %v402_v0, %v1192_v43  ;;  %v564_v15 = vrot.slane %v563_v58, 4 }
  0xb5   :  { %v498_v42 = vmax.f32 %v325_v23, 0.0  ;;  %v554_v14 = vadd.f32 %v553_v59, %v544_v57  ;;  %v476_v17 = vmax.f32 %v374_v62, 0.0 }
  0xb6   :  { %v499_v47 = vmax.f32 %v354_v27, 0.0  ;;  %v477_v20 = vmax.f32 %v403_v4, 0.0  ;;  %v1250_v24 = vadd.f32 %v564_v15, %v563_v58 }
  0xb7   :  { %v546_v61 = vmul.f32 %v1222_v22, %v498_v42  ;;  %v555_v23 = vrot.slane %v554_v14, 4  ;;  %v524_v27 = vmul.f32 %v1196_v49, %v476_v17 }
  0xb8   :  { %v547_v3 = vmul.f32 %v1222_v22, %v499_v47  ;;  %v525_v32 = vmul.f32 %v1196_v49, %v477_v20 }
  0xb9   :  { %v572_v16 = vadd.f32 %v571_v8, %v546_v61  ;;  %v566_v8 = vrot.slane %v1250_v24, 2 }
  0xba   :  { %v1227_v28 = vpop.f32.mrf.mxu2  ;;  %v376_v29 = vpop.f32.mrf.mxu0  ;;  %v581_v19 = vadd.f32 %v580_v12, %v547_v3  ;;  %v556_v3 = vadd.f32 %v555_v23, %v554_v14 }
  0xbb   :  { %v1230_v34 = vpop.f32.mrf.mxu3  ;;  %v405_v35 = vpop.f32.mrf.mxu1  ;;  %v377_v63 = vadd.f32 %v376_v29, %v1198_v54  ;;  %v573_v26 = vrot.slane %v572_v16, 4  ;;  %v432_v38 = vadd.f32 %v1227_v28, %v1192_v43 }
  0xbc   :  { %v406_v5 = vadd.f32 %v405_v35, %v1198_v54  ;;  %v582_v31 = vrot.slane %v581_v19, 4  ;;  %v461_v45 = vadd.f32 %v1230_v34, %v1192_v43 }
  0xbd   :  { %v484_v18 = vmax.f32 %v377_v63, 0.0  ;;  %v574_v50 = vadd.f32 %v573_v26, %v572_v16  ;;  %v478_v59 = vmax.f32 %v432_v38, 0.0 }
  0xbe   :  { %v485_v0 = vmax.f32 %v406_v5, 0.0  ;;  %v583_v53 = vadd.f32 %v582_v31, %v581_v19  ;;  %v479_v43 = vmax.f32 %v461_v45, 0.0 }
  0xbf   :  { %v532_v29 = vmul.f32 %v1206_v1, %v484_v18  ;;  %v575_v4 = vrot.slane %v574_v50, 2  ;;  %v526_v12 = vmul.f32 %v1196_v49, %v478_v59 }
  0xc0   :  { %v533_v33 = vmul.f32 %v1206_v1, %v485_v0  ;;  %v527_v14 = vmul.f32 %v1196_v49, %v479_v43 }
  0xc1   :  { %v588_v51 = vadd.f32 %v532_v29, %v524_v27  ;;  %v576_v0 = vadd.f32 %v575_v4, %v574_v50 }
  0xc2   :  { %v434_v6 = vpop.f32.mrf.mxu2  ;;  %v379_v7 = vpop.f32.mrf.mxu0  ;;  %v597_v55 = vadd.f32 %v533_v33, %v525_v32  ;;  %v567_v33 = vadd.f32 %v566_v8, %v1250_v24 }
  0xc3   :  { %v463_v9 = vpop.f32.mrf.mxu3  ;;  %v380_v10 = vadd.f32 %v379_v7, %v1194_v48  ;;  %v408_v11 = vpop.f32.mrf.mxu1  ;;  %v435_v30 = vadd.f32 %v434_v6, %v1198_v54  ;;  %v584_v7 = vrot.slane %v583_v53, 2  ;;  %v577_v38 = vrot.slane %v576_v0, 1 }
  0xc4   :  { %v409_v60 = vadd.f32 %v408_v11, %v1194_v48  ;;  %v464_v35 = vadd.f32 %v463_v9, %v1198_v54 }
  0xc5   :  { %v492_v21 = vmax.f32 %v380_v10, 0.0  ;;  %v486_v28 = vmax.f32 %v435_v30, 0.0  ;;  %v578_v50 = vadd.f32 %v577_v38, %v576_v0 }
  0xc6   :  { %v493_v25 = vmax.f32 %v409_v60, 0.0  ;;  %v487_v57 = vmax.f32 %v464_v35, 0.0 }
  0xc7   :  { %v540_v39 = vmul.f32 %v1216_v13, %v492_v21  ;;  %v534_v5 = vmul.f32 %v1206_v1, %v486_v28 }
  0xc8   :  { %v541_v46 = vmul.f32 %v1216_v13, %v493_v25  ;;  %v535_v9 = vmul.f32 %v1206_v1, %v487_v57  ;;  %v585_v25 = vadd.f32 %v584_v7, %v583_v53 }
  0xc9   :  { %v589_v61 = vadd.f32 %v588_v51, %v540_v39  ;;  %v606_v21 = vadd.f32 %v534_v5, %v526_v12 }
  0xca   :  { %v437_v36 = vpop.f32.mrf.mxu2  ;;  %v382_v37 = vpop.f32.mrf.mxu0  ;;  %v598_v34 = vadd.f32 %v597_v55, %v541_v46  ;;  %v615_v26 = vadd.f32 %v535_v9, %v527_v14  ;;  %v586_v39 = vrot.slane %v585_v25, 1 }
  0xcb   :  { %v438_v40 = vadd.f32 %v437_v36, %v1194_v48  ;;  %v466_v41 = vpop.f32.mrf.mxu3  ;;  %v383_v42 = vadd.f32 %v382_v37, %v1201_v56  ;;  %v411_v44 = vpop.f32.mrf.mxu1  ;;  %v557_v36 = vrot.slane %v556_v3, 2 }
  0xcc   :  { %v467_v54 = vadd.f32 %v466_v41, %v1194_v48  ;;  %v412_v47 = vadd.f32 %v411_v44, %v1201_v56  ;;  %v568_v44 = vrot.slane %v567_v33, 1  ;;  %v587_v51 = vadd.f32 %v586_v39, %v585_v25 }
  0xcd   :  { %v500_v52 = vmax.f32 %v383_v42, 0.0  ;;  %v494_v62 = vmax.f32 %v438_v40, 0.0  ;;  %v558_v24 = vadd.f32 %v557_v36, %v556_v3 }
  0xce   :  { %v501_v58 = vmax.f32 %v412_v47, 0.0  ;;  %v495_v2 = vmax.f32 %v467_v54, 0.0  ;;  %v569_v53 = vadd.f32 %v568_v44, %v567_v33 }
  0xcf   :  { %v548_v63 = vmul.f32 %v1222_v22, %v500_v52  ;;  %v542_v15 = vmul.f32 %v1216_v13, %v494_v62 }
  0xd0   :  { %v549_v48 = vmul.f32 %v1222_v22, %v501_v58  ;;  %v543_v18 = vmul.f32 %v1216_v13, %v495_v2  ;;  %v628_v58 = vpop.permute.xlu2 %627 }
  0xd1   :  { %v590_v6 = vadd.f32 %v589_v61, %v548_v63  ;;  %v607_v30 = vadd.f32 %v606_v21, %v542_v15  ;;  %v559_v61 = vrot.slane %v558_v24, 1  ;;  %v632_v62 = vadd.f32 %v628_v58, %v578_v50 }
  0xd2   :  { %v599_v10 = vadd.f32 %v598_v34, %v549_v48  ;;  %v440_v11 = vpop.f32.mrf.mxu2  ;;  %v616_v49 = vadd.f32 %v615_v26, %v543_v18  ;;  %v633_v63 = vadd.f32 %v628_v58, %v587_v51  ;;  %v631_v2 = vadd.f32 %v628_v58, %v569_v53 }
  0xd3   :  { %v591_v60 = vrot.slane %v590_v6, 4  ;;  %v441_v16 = vadd.f32 %v440_v11, %v1201_v56  ;;  %v469_v17 = vpop.f32.mrf.mxu3  ;;  %v560_v7 = vadd.f32 %v559_v61, %v558_v24  ;;  %v647_v3 = vrot.slane %v632_v62, 6 }
  0xd4   :  { %v600_v19 = vrot.slane %v599_v10, 4  ;;  %v470_v20 = vadd.f32 %v469_v17, %v1201_v56  ;;  %v648_v8 = vrot.slane %v633_v63, 5  ;;  %v646_v11 = vrot.slane %v631_v2, 7 }
  0xd5   :  { %v592_v1 = vadd.f32 %v591_v60, %v590_v6  ;;  %v502_v23 = vmax.f32 %v441_v16, 0.0  ;;  %v630_v17 = vadd.f32 %v628_v58, %v560_v7 }
  0xd6   :  { %v601_v27 = vadd.f32 %v600_v19, %v599_v10  ;;  %v503_v29 = vmax.f32 %v470_v20, 0.0  ;;  %v656_v14 = vsel %vm655_vm5, %v647_v3, %v648_v8 }
  0xd7   :  { %v593_v31 = vrot.slane %v592_v1, 2  ;;  %v550_v32 = vmul.f32 %v1222_v22, %v502_v23  ;;  %v654_v19 = vsel %vm653_vm1, %v630_v17, %v646_v11 }
  0xd8   :  { %v602_v35 = vrot.slane %v601_v27, 2  ;;  %v551_v13 = vmul.f32 %v1222_v22, %v503_v29  ;;  %v658_v21 = vsel %vm657_vm6, %v654_v19, %v656_v14 }
  0xd9   :  { %v594_v56 = vadd.f32 %v593_v31, %v592_v1  ;;  %v608_v37 = vadd.f32 %v607_v30, %v550_v32 }
  0xda   :  { %v603_v40 = vadd.f32 %v602_v35, %v601_v27  ;;  %v617_v41 = vadd.f32 %v616_v49, %v551_v13 }
  0xdb   :  { %v609_v42 = vrot.slane %v608_v37, 4  ;;  %v595_v45 = vrot.slane %v594_v56, 1 }
  0xdc   :  { %v604_v46 = vrot.slane %v603_v40, 1  ;;  %v618_v54 = vrot.slane %v617_v41, 4 }
  0xdd   :  { %v610_v47 = vadd.f32 %v609_v42, %v608_v37  ;;  %v596_v22 = vadd.f32 %v595_v45, %v594_v56 }
  0xde   :  { %v619_v28 = vadd.f32 %v618_v54, %v617_v41  ;;  %v605_v55 = vadd.f32 %v604_v46, %v603_v40 }
  0xdf   :  { %v611_v52 = vrot.slane %v610_v47, 2  ;;  %v634_v48 = vadd.f32 %v628_v58, %v596_v22 }
  0xe0   :  { %v620_v57 = vrot.slane %v619_v28, 2  ;;  %v635_v4 = vadd.f32 %v628_v58, %v605_v55 }
  0xe1   :  { %v612_v59 = vadd.f32 %v611_v52, %v610_v47  ;;  %v649_v12 = vrot.slane %v634_v48, 4 }
  0xe2   :  { %v621_v43 = vadd.f32 %v620_v57, %v619_v28  ;;  %v650_v15 = vrot.slane %v635_v4, 3 }
  0xe3   :  { %v613_v34 = vrot.slane %v612_v59, 1 }
  0xe4   :  { %v622_v5 = vrot.slane %v621_v43, 1  ;;  %v660_v20 = vsel %vm659_vm7, %v649_v12, %v650_v15 }
  0xe5   :  { %v614_v6 = vadd.f32 %v613_v34, %v612_v59 }
  0xe6   :  { %v623_v9 = vadd.f32 %v622_v5, %v621_v43 }
  0xe7   :  { %v636_v10 = vadd.f32 %v628_v58, %v614_v6 }
  0xe8   :  { %v637_v60 = vadd.f32 %v628_v58, %v623_v9 }
  0xe9   :  { %v651_v16 = vrot.slane %v636_v10, 2 }
  0xea   :  { %v652_v18 = vrot.slane %v637_v60, 1 }
  0xec   :  { %v662_v0 = vsel %vm661_vm8, %v651_v16, %v652_v18 }
  0xed   :  { %v664_v1 = vsel %vm663_vm9, %v660_v20, %v662_v0 }
  0xee   :  { %v666_v23 = vsel %vm665_vm10, %v658_v21, %v664_v1 }
  0xef   :  { %668 = vst [vmem:[%s1289_s3] sm:$0xff] %v666_v23 }

</bundles_post_ra>
